<compile_context>
chip_gen: v6e
topology: v6e:2x2x1
jax: 0.10.0
libtpu: 0.0.40
codegen_flags: <defaults>
</compile_context>

<pallas_src>
import functools
import math

import jax
import jax.numpy as jnp
from jax.experimental import pallas as pl
from jax.experimental.pallas import tpu as pltpu


def _round_up(x: int, m: int) -> int:
    return ((x + m - 1) // m) * m


def _lr_linear_kernel(x_ref, wm_ref, wv_ref, bm_ref, bv_ref, eps_ref, o_ref):
    """One (M-tile, N-tile) block of the local-reparameterization linear layer.

    x_ref   : (tm, K)   inputs (no bias column)
    wm_ref  : (K, tn)   weight means, pre-transposed
    wv_ref  : (K, tn)   weight variances, pre-transposed (non-negative)
    bm_ref  : (1, tn)   bias-column means   (zeros if bias=False)
    bv_ref  : (1, tn)   bias-column variances (zeros if bias=False)
    eps_ref : (tm, tn)  standard-normal noise
    o_ref   : (tm, tn)  output
    """
    x = x_ref[...]

    # reparam_mean = X @ w_mean.T  ->  X @ wmT   (MXU, f32 accumulation)
    mean = jnp.dot(x, wm_ref[...], preferred_element_type=jnp.float32)
    # reparam_var  = X**2 @ w_var.T -> X^2 @ wvT (MXU)
    var = jnp.dot(x * x, wv_ref[...], preferred_element_type=jnp.float32)

    # bias column contribution: ones-column @ w[:, -1]  ==  broadcast add (VPU)
    mean = mean + bm_ref[...]
    var = var + bv_ref[...]

    # result = mean + sqrt(var) * eps   (EUP sqrt + VPU FMA, hides under next matmul)
    o_ref[...] = (mean + jnp.sqrt(var) * eps_ref[...]).astype(o_ref.dtype)


@functools.partial(jax.jit, static_argnames=("tm", "tn"))
def _lr_linear_flat(x, wmT, wvT, b_mean, b_var, eps, *, tm, tn):
    """x: (M, K), wmT/wvT: (K, N), b_mean/b_var: (1, N), eps: (M, N) -> (M, N)."""
    M, K = x.shape
    K2, N = wmT.shape
    assert K == K2 and eps.shape == (M, N)
    assert b_mean.shape == (1, N) and b_var.shape == (1, N)

    # Effective tile sizes: hardware-aligned, clamped for small problems.
    tm_eff = min(tm, _round_up(M, 8))       # sublane multiple
    tn_eff = min(tn, _round_up(N, 128))     # lane multiple (lane-dense output)

    M_pad = _round_up(M, tm_eff)
    N_pad = _round_up(N, tn_eff)

    if M_pad != M:
        x = jnp.pad(x, ((0, M_pad - M), (0, 0)))
        eps = jnp.pad(eps, ((0, M_pad - M), (0, 0)))
    if N_pad != N:
        wmT = jnp.pad(wmT, ((0, 0), (0, N_pad - N)))
        wvT = jnp.pad(wvT, ((0, 0), (0, N_pad - N)))
        b_mean = jnp.pad(b_mean, ((0, 0), (0, N_pad - N)))
        b_var = jnp.pad(b_var, ((0, 0), (0, N_pad - N)))
        eps = jnp.pad(eps, ((0, 0), (0, N_pad - N)))

    grid = (M_pad // tm_eff, N_pad // tn_eff)

    # Explicit VMEM budget: double-buffered x / weights / bias / eps / out tiles.
    itemsize = 4  # f32
    tile_bytes = itemsize * (
        tm_eff * K            # x tile
        + 2 * K * tn_eff      # wmT + wvT tiles
        + 2 * tn_eff          # bias mean/var tiles
        + 2 * tm_eff * tn_eff # eps + out tiles
    )
    vmem_limit = min(max(2 * tile_bytes + (4 << 20), 16 << 20), 64 << 20)

    cost = pl.CostEstimate(
        flops=4 * M_pad * N_pad * K,          # two matmuls
        transcendentals=M_pad * N_pad,        # sqrt
        bytes_accessed=itemsize * (M_pad * K + 2 * K * N_pad + 2 * N_pad
                                   + 2 * M_pad * N_pad),
    )

    out = pl.pallas_call(
        _lr_linear_kernel,
        out_shape=jax.ShapeDtypeStruct((M_pad, N_pad), x.dtype),
        grid_spec=pltpu.PrefetchScalarGridSpec(
            num_scalar_prefetch=0,
            grid=grid,
            in_specs=[
                pl.BlockSpec((tm_eff, K), lambda i, j: (i, 0)),      # x tile
                pl.BlockSpec((K, tn_eff), lambda i, j: (0, j)),      # w_mean^T tile
                pl.BlockSpec((K, tn_eff), lambda i, j: (0, j)),      # w_var^T tile
                pl.BlockSpec((1, tn_eff), lambda i, j: (0, j)),      # bias mean
                pl.BlockSpec((1, tn_eff), lambda i, j: (0, j)),      # bias var
                pl.BlockSpec((tm_eff, tn_eff), lambda i, j: (i, j)), # eps tile
            ],
            out_specs=pl.BlockSpec((tm_eff, tn_eff), lambda i, j: (i, j)),
        ),
        compiler_params=pltpu.CompilerParams(
            dimension_semantics=("parallel", "parallel"),
            vmem_limit_bytes=vmem_limit,
        ),
        cost_estimate=cost,
    )(x, wmT, wvT, b_mean, b_var, eps)

    return out[:M, :N]


def abstract_lr_linear_forward(X, w_mean, w_var, eps, *, bias=True, tm=256, tn=256):
    """JAX/Pallas equivalent of AbstractLRLinear.forward.

    X      : (*sample_shape, batch, in_features)
    w_mean : (out_features, in_features + bias)
    w_var  : (out_features, in_features + bias), non-negative
    eps    : (*sample_shape, batch, out_features)  standard-normal noise
    """
    fan_in = w_mean.shape[1]
    in_features = fan_in - (1 if bias else 0)
    out_features = w_mean.shape[0]
    assert X.shape[-1] == in_features
    assert w_var.shape == w_mean.shape

    lead = X.shape[:-1]
    M = math.prod(lead) if lead else 1

    x_flat = X.reshape(M, in_features)
    eps_flat = eps.reshape(M, out_features)

    # Split off the bias column instead of concatenating a ones column onto X:
    # ones @ w[:, -1].T == broadcast-add of the bias column (done in-kernel).
    if bias:
        wm_in = w_mean[:, :in_features]
        wv_in = w_var[:, :in_features]
        b_mean = w_mean[:, in_features:].T            # (1, N)
        b_var = w_var[:, in_features:].T              # (1, N)
    else:
        wm_in, wv_in = w_mean, w_var
        b_mean = jnp.zeros((1, out_features), dtype=w_mean.dtype)
        b_var = jnp.zeros((1, out_features), dtype=w_var.dtype)

    # Pre-transpose ONCE so the kernel feeds the MXU with a (K, N) RHS
    # (no per-grid-step transpose inside the kernel).
    wmT = wm_in.T
    wvT = wv_in.T

    out_flat = _lr_linear_flat(x_flat, wmT, wvT, b_mean, b_var, eps_flat,
                               tm=tm, tn=tn)
    out = out_flat.reshape(*lead, out_features)
    assert out.shape[-1] == out_features
    return out


def _reference_forward(X, w_mean, w_var, eps, *, bias=True):
    """Pure-JAX reference mirroring the PyTorch forward (same eps)."""
    if bias:
        ones = jnp.ones((*X.shape[:-1], 1), dtype=X.dtype)
        X = jnp.concatenate([X, ones], axis=-1)
    reparam_mean = X @ w_mean.T
    reparam_var = (X ** 2) @ w_var.T
    return reparam_mean + jnp.sqrt(reparam_var) * eps


if __name__ == "__main__":
    # Small, forward-consistent shapes: sample_shape=(2,), batch=8,
    # in_features=32, out_features=32, bias=True.
    samples, batch = 2, 8
    in_features, out_features = 32, 32
    bias = True

    key = jax.random.PRNGKey(0)
    k_x, k_wm, k_wv, k_eps = jax.random.split(key, 4)

    X = jax.random.normal(k_x, (samples, batch, in_features), dtype=jnp.float32)

    # Deterministic synthetic "Weights": factorised Gaussian over a
    # (out_features, in_features + bias) weight matrix.
    fan_in = in_features + (1 if bias else 0)
    w_mean = jax.random.normal(k_wm, (out_features, fan_in), dtype=jnp.float32)
    w_mean = w_mean / jnp.sqrt(jnp.float32(fan_in))
    log_var = -4.0 + 0.1 * jax.random.normal(k_wv, (out_features, fan_in),
                                             dtype=jnp.float32)
    w_var = jnp.exp(log_var)  # strictly positive variances

    # Local-reparameterization noise (torch.randn_like equivalent).
    eps = jax.random.normal(k_eps, (samples, batch, out_features),
                            dtype=jnp.float32)

    out = abstract_lr_linear_forward(X, w_mean, w_var, eps, bias=bias)
    out = jax.block_until_ready(out)

    ref = _reference_forward(X, w_mean, w_var, eps, bias=bias)
    assert out.shape == (samples, batch, out_features)
    assert jnp.allclose(out, ref, atol=1e-5, rtol=1e-5)

    print("KERNEL_OK")
</pallas_src>

<mosaic_0001>
module attributes {stable_mosaic.version = 11 : i64} {
  func.func @_lr_linear_kernel(%arg0: i32, %arg1: i32, %arg2: memref<16x32xf32, #tpu.memory_space<vmem>>, %arg3: memref<32x128xf32, #tpu.memory_space<vmem>>, %arg4: memref<32x128xf32, #tpu.memory_space<vmem>>, %arg5: memref<1x128xf32, #tpu.memory_space<vmem>>, %arg6: memref<1x128xf32, #tpu.memory_space<vmem>>, %arg7: memref<16x128xf32, #tpu.memory_space<vmem>>, %arg8: memref<16x128xf32, #tpu.memory_space<vmem>>) attributes {dimension_semantics = [#tpu.dimension_semantics<parallel>, #tpu.dimension_semantics<parallel>], iteration_bounds = array<i64: 1, 1>, scalar_prefetch = 0 : i64, scratch_operands = 0 : i64, tpu.core_type = #tpu.core_type<tc>, window_params = [{transform_indices = @transform_0, window_bounds = array<i64: 16, 32>}, {transform_indices = @transform_1, window_bounds = array<i64: 32, 128>}, {transform_indices = @transform_2, window_bounds = array<i64: 32, 128>}, {transform_indices = @transform_3, window_bounds = array<i64: 1, 128>}, {transform_indices = @transform_4, window_bounds = array<i64: 1, 128>}, {transform_indices = @transform_5, window_bounds = array<i64: 16, 128>}, {transform_indices = @transform_6, window_bounds = array<i64: 16, 128>}]} {
    %c0 = arith.constant 0 : index
    %c0_0 = arith.constant 0 : index
    %0 = vector.load %arg2[%c0, %c0_0] : memref<16x32xf32, #tpu.memory_space<vmem>>, vector<16x32xf32>
    %c0_1 = arith.constant 0 : index
    %c0_2 = arith.constant 0 : index
    %1 = vector.load %arg3[%c0_1, %c0_2] : memref<32x128xf32, #tpu.memory_space<vmem>>, vector<32x128xf32>
    %cst = arith.constant dense<0.000000e+00> : vector<16x128xf32>
    %2 = tpu.matmul %0, %1, %cst {dimension_numbers = #tpu.dot_dimension_numbers<[1], [0], [0], [1], [0, 0, 1, 1], [], []>} : vector<16x32xf32>, vector<32x128xf32>, vector<16x128xf32> -> vector<16x128xf32>
    %3 = arith.mulf %0, %0 : vector<16x32xf32>
    %c0_3 = arith.constant 0 : index
    %c0_4 = arith.constant 0 : index
    %4 = vector.load %arg4[%c0_3, %c0_4] : memref<32x128xf32, #tpu.memory_space<vmem>>, vector<32x128xf32>
    %cst_5 = arith.constant dense<0.000000e+00> : vector<16x128xf32>
    %5 = tpu.matmul %3, %4, %cst_5 {dimension_numbers = #tpu.dot_dimension_numbers<[1], [0], [0], [1], [0, 0, 1, 1], [], []>} : vector<16x32xf32>, vector<32x128xf32>, vector<16x128xf32> -> vector<16x128xf32>
    %c0_6 = arith.constant 0 : index
    %c0_7 = arith.constant 0 : index
    %6 = vector.load %arg5[%c0_6, %c0_7] : memref<1x128xf32, #tpu.memory_space<vmem>>, vector<1x128xf32>
    %7 = vector.broadcast %6 : vector<1x128xf32> to vector<16x128xf32>
    %8 = arith.addf %2, %7 : vector<16x128xf32>
    %c0_8 = arith.constant 0 : index
    %c0_9 = arith.constant 0 : index
    %9 = vector.load %arg6[%c0_8, %c0_9] : memref<1x128xf32, #tpu.memory_space<vmem>>, vector<1x128xf32>
    %10 = vector.broadcast %9 : vector<1x128xf32> to vector<16x128xf32>
    %11 = arith.addf %5, %10 : vector<16x128xf32>
    %12 = math.sqrt %11 : vector<16x128xf32>
    %c0_10 = arith.constant 0 : index
    %c0_11 = arith.constant 0 : index
    %13 = vector.load %arg7[%c0_10, %c0_11] : memref<16x128xf32, #tpu.memory_space<vmem>>, vector<16x128xf32>
    %14 = arith.mulf %12, %13 : vector<16x128xf32>
    %15 = arith.addf %8, %14 : vector<16x128xf32>
    %c0_12 = arith.constant 0 : index
    %c0_13 = arith.constant 0 : index
    %16 = vector.load %arg8[%c0_12, %c0_13] : memref<16x128xf32, #tpu.memory_space<vmem>>, vector<16x128xf32>
    tpu.vector_store %arg8[%c0_12, %c0_13], %15 {strides = array<i32>} : memref<16x128xf32, #tpu.memory_space<vmem>>, vector<16x128xf32>,
    return
  }
  func.func @transform_0(%arg0: i32, %arg1: i32) -> (i32, i32) {
    %c0_i32 = arith.constant 0 : i32
    %c0_i32_0 = arith.constant 0 : i32
    return %arg0, %c0_i32 : i32, i32
  }
  func.func @transform_1(%arg0: i32, %arg1: i32) -> (i32, i32) {
    %c0_i32 = arith.constant 0 : i32
    %c0_i32_0 = arith.constant 0 : i32
    return %c0_i32, %arg1 : i32, i32
  }
  func.func @transform_2(%arg0: i32, %arg1: i32) -> (i32, i32) {
    %c0_i32 = arith.constant 0 : i32
    %c0_i32_0 = arith.constant 0 : i32
    return %c0_i32, %arg1 : i32, i32
  }
  func.func @transform_3(%arg0: i32, %arg1: i32) -> (i32, i32) {
    %c0_i32 = arith.constant 0 : i32
    %c0_i32_0 = arith.constant 0 : i32
    return %c0_i32, %arg1 : i32, i32
  }
  func.func @transform_4(%arg0: i32, %arg1: i32) -> (i32, i32) {
    %c0_i32 = arith.constant 0 : i32
    %c0_i32_0 = arith.constant 0 : i32
    return %c0_i32, %arg1 : i32, i32
  }
  func.func @transform_5(%arg0: i32, %arg1: i32) -> (i32, i32) {
    %c0_i32 = arith.constant 0 : i32
    return %arg0, %arg1 : i32, i32
  }
  func.func @transform_6(%arg0: i32, %arg1: i32) -> (i32, i32) {
    %c0_i32 = arith.constant 0 : i32
    return %arg0, %arg1 : i32, i32
  }
}

</mosaic_0001>

<bundles_post_ra>
// kernel: _lr_linear_flat.1
= control target key start
LH: loop header
LB: loop body
LE: loop exit
PB: predicated region body
PF: predicated region fallthrough
CT: control target
= control target key end

     0   :  { %vm43_vm0 = vcmask 261120   ;;  %s407_s0 = inlined_call_operand.vmem [shape: f32[16,32], index: 0, kind: input, shape index: {}]   ;;  %s408_s1 = inlined_call_operand.vmem [shape: f32[32,128], index: 1, kind: input, shape index: {}]   ;;  %s409_s2 = inlined_call_operand.vmem [shape: f32[32,128], index: 2, kind: input, shape index: {}]   ;;  %s410_s3 = inlined_call_operand.vmem [shape: f32[1,128], index: 3, kind: input, shape index: {}]   ;;  %s411_s4 = inlined_call_operand.vmem [shape: f32[1,128], index: 4, kind: input, shape index: {}]   ;;  %s412_s5 = inlined_call_operand.vmem [shape: f32[16,128], index: 5, kind: input, shape index: {}]   ;;  %s413_s6 = inlined_call_operand.hbm [shape: f32[16,128], index: 6, kind: output, shape index: {}]  }
   0x1   :  { %v35_v0 = vld [vmem:[%s409_s2 + $0x18] sm:$0xff]  ;;  %v34_v1 = vld [vmem:[%s409_s2 + $0x10] sm:$0xff]  ;;  %v24_v2 = vld [vmem:[%s407_s0] sm:$0xff] }
   0x2   :  { %280 = vmatprep.subr.mxu1 %v35_v0  ;;  %v33_v3 = vld [vmem:[%s409_s2 + $0x8] sm:$0xff]  ;;  %v30_v4 = vmul.f32 %v24_v2, %v24_v2  ;;  %v29_v6 = vld [vmem:[%s408_s1 + $0x18] sm:$0xff]  ;;  %277 = vmatprep.mubr.msk.f32.mxu0 %vm43_vm0, %v24_v2  ;;  %v28_v7 = vld [vmem:[%s408_s1 + $0x10] sm:$0xff] }
   0x3   :  { %281 = vmatpush3.msra.mxu1 %v35_v0  ;;  %v25_v5 = vld [vmem:[%s407_s0 + $0x8] sm:$0xff]  ;;  %269 = vmatprep.subr.mxu0 %v29_v6 }
   0x4   :  { %282 = vmatprep.subr.mxu1 %v34_v1 }
   0x5   :  { %11 = vsyncpa [#allocation3], 0  ;;  %283 = vmatpush3.msra.mxu1 %v34_v1  ;;  %v32_v8 = vld [vmem:[%s409_s2] sm:$0xff]  ;;  %288 = vmatprep.mubr.msk.f32.mxu1 %vm43_vm0, %v30_v4  ;;  %v31_v9 = vmul.f32 %v25_v5, %v25_v5  ;;  %v27_v10 = vld [vmem:[%s408_s1 + $0x8] sm:$0xff] }
   0x6   :  { %284 = vmatprep.subr.mxu1 %v33_v3  ;;  %270 = vmatpush3.msra.mxu0 %v29_v6  ;;  %v26_v11 = vld [vmem:[%s408_s1] sm:$0xff]  ;;  %v228_v23 = vld [vmem:[%s412_s5 + $0x8] sm:$0xff] }
   0x7   :  { %285 = vmatpush3.msra.mxu1 %v33_v3  ;;  %271 = vmatprep.subr.mxu0 %v28_v7  ;;  %v254_v12 = vld [vmem:[%s411_s4] ss:$0 sm:$0xff] }
   0x8   :  { %286 = vmatprep.subr.mxu1 %v32_v8  ;;  %272 = vmatpush3.msra.mxu0 %v28_v7  ;;  %v251_v19 = vld [vmem:[%s410_s3] ss:$0 sm:$0xff]  ;;  %s320_s3 = smov [#allocation2]  }
   0x9   :  { %287 = vmatpush3.msra.mxu1 %v32_v8  ;;  %273 = vmatprep.subr.mxu0 %v27_v10  ;;  %v227_v30 = vld [vmem:[%s412_s5] sm:$0xff]  ;;  %s240_s21 = sshll.u32 %s320_s3, 4  ;;  %s241_s21 = int_to_ptr.vmem [resolvable:$true] %s240_s21 }
   0xa   :  { %289 = vmatmul.mubr.msk.f32.vlgmr.msra.gmra.mxu1 %vm43_vm0, %v31_v9  ;;  %274 = vmatpush3.msra.mxu0 %v27_v10  ;;  %s298_s22 = scalar_lea.vmem %s241_s21, 256  ;;  %p303_p1 = scmp.lt.s32.totalorder %s241_s21, %s241_s21 }
   0xb   :  { %275 = vmatprep.subr.mxu0 %v26_v11  ;;  %p299_p0 = scmp.ne.s32.totalorder %s241_s21, %s298_s22  ;;  %p304_p2 = scmp.lt.s32.totalorder %s298_s22, %s298_s22 }
   0xc   :  { %276 = vmatpush3.msra.mxu0 %v26_v11 }
   0xd   :  { %278 = vmatmul.mubr.msk.f32.vlgmr.msra.gmra.mxu0 %vm43_vm0, %v25_v5  ;;  %p305_p3 = por %p304_p2, %p303_p1 }
   0xf   :  { %p306_p4 = pnand %p305_p3, %p299_p0 }
  0xca   :  { %v290_v13 = vpop.f32.mrf.mxu1 }
  0xcb   :  { %v210_v14 = vadd.f32 %v290_v13, %v254_v12 }
  0xcc   :  { %v204_v15 = vpop.f32.mrf.mxu1 }
  0xcd   :  { %294 = vrsqrt.f32 %v210_v14  ;;  %v205_v16 = vadd.f32 %v254_v12, %v204_v15  ;;  %v279_v18 = vpop.f32.mrf.mxu0  ;;  %vm222_vm1 = vcmp.eq.f32.partialorder %v210_v14, inf  ;;  %v225_v22 = vand.u32 2147483648, %v210_v14 }
  0xce   :  { %v122_v24 = vadd.f32 %v279_v18, %v251_v19  ;;  %vm224_vm2 = vcmp.eq.f32.partialorder %v210_v14, 0.0 }
  0xcf   :  { %296 = vrsqrt.f32 %v205_v16  ;;  %v116_v28 = vpop.f32.mrf.mxu0  ;;  %vm215_vm3 = vcmp.eq.f32.partialorder %v205_v16, inf  ;;  %v218_v29 = vand.u32 2147483648, %v205_v16  ;;  %vm217_vm4 = vcmp.eq.f32.partialorder %v205_v16, 0.0 }
  0xd0   :  { %v117_v35 = vadd.f32 %v251_v19, %v116_v28 }
  0xda   :  { %v295_v17 = vpop.eup %294 }
  0xdb   :  { %v221_v20 = vmul.f32 %v295_v17, %v210_v14 }
  0xdc   :  { %v297_v21 = vpop.eup %296 }
  0xdd   :  { %v223_v25 = vsel %vm222_vm1, %v210_v14, %v221_v20  ;;  %v214_v26 = vmul.f32 %v297_v21, %v205_v16 }
  0xde   :  { %v226_v27 = vsel %vm224_vm2, %v225_v22, %v223_v25 }
  0xdf   :  { %v230_v31 = vmul.f32 %v228_v23, %v226_v27  ;;  %v216_v32 = vsel %vm215_vm3, %v205_v16, %v214_v26 }
  0xe0   :  { %v219_v33 = vsel %vm217_vm4, %v218_v29, %v216_v32 }
  0xe1   :  { %v232_v34 = vadd.f32 %v230_v31, %v122_v24  ;;  %v229_v36 = vmul.f32 %v227_v30, %v219_v33 }
  0xe3   :  { %234 = vst [vmem:[#allocation2 + $0x8] sm:$0xff] %v232_v34  ;;  %v231_v37 = vadd.f32 %v229_v36, %v117_v35 }
  0xe5   :  { %233 = vst [vmem:[#allocation2] sm:$0xff] %v231_v37 }
  0xe6   :  { %309 = shalt.err (!%p306_p4)
}
  0xe7   :  { %s321_s5 = smov 128   ;;  %s322_s23 = smov 8  }
  0xe8   :  { %246 = dma.vmem_to_hbm [thread:$0]  %s241_s21, 256, %s413_s6, [#allocation3], %s321_s5, %s321_s5, %s322_s23  }
  0xe9   :  { %318 = dma.done.wait [#allocation3], 256  }
  0xea   :  { %319 = vsyncadd [#allocation3], 4294967040 }
  0xeb   :  { %250 = vsyncpa [#allocation3], 1 }

</bundles_post_ra>
